<compile_context>
chip_gen: v7x
topology: tpu7x:2x2x1
jax: 0.10.0
libtpu: 0.0.40
codegen_flags: <defaults>
</compile_context>

<pallas_src>
import jax
import jax.numpy as jnp
from jax.experimental import pallas as pl
from jax.experimental.pallas import tpu as pltpu

HIDDEN = 32
LANE = 128
NEG_BIG = -1e30  # bias for padded class lanes -> exp() underflows to exactly 0


def net_qc_w_kernel(x_ref, wb1_ref, wb2_ref, o_ref):
    """One batch tile of softmax(tanh(x @ W1 + b1) @ W2 + b2).

    x_ref  : [TILE_N, K]      input tile (caller dtype, f32 or bf16)
    wb1_ref: [K + 1, H]       W1 rows 0..K-1, b1 as row K          (VMEM resident)
    wb2_ref: [H + 1, C_PAD]   W2 rows 0..H-1, b2 as row H; padded
                              class columns carry -1e30 bias        (VMEM resident)
    o_ref  : [TILE_N, C_PAD]  lane-dense output tile (f32)
    """
    K = wb1_ref.shape[0] - 1
    H = wb2_ref.shape[0] - 1

    x = x_ref[...]                       # no upcast; MXU accumulates in f32
    w1 = wb1_ref[:K, :]
    b1 = wb1_ref[K:K + 1, :]
    w2 = wb2_ref[:H, :]
    b2 = wb2_ref[H:H + 1, :]

    # fc1 + tanh (f32 accumulation / f32 elementwise)
    h = jnp.tanh(jnp.dot(x, w1, preferred_element_type=jnp.float32) + b1)

    # fc3
    logits = jnp.dot(h, w2, preferred_element_type=jnp.float32) + b2

    # Numerically stable softmax over the (lane-dense, padded) class dim;
    # padded lanes hold ~-1e30 logits -> exp == 0, so they don't perturb it.
    # Exact division for the normalizer: the approximate EUP reciprocal has
    # ~1e-3 relative error, which breaks "rows sum to 1" at tight tolerances,
    # and this kernel is memory-bound anyway so the exact divide is free.
    m = jnp.max(logits, axis=-1, keepdims=True)
    e = jnp.exp(logits - m)
    denom = jnp.sum(e, axis=-1, keepdims=True)
    o_ref[...] = (e / denom).astype(o_ref.dtype)


def net_qc_w_forward(x, w1, b1, w2, b2, *, tile_n=1024):
    N, K = x.shape
    H = w1.shape[1]
    C = w2.shape[1]
    c_pad = pl.cdiv(C, LANE) * LANE

    # Pack tiny params: bias as an extra weight row; pad class dim to 128 lanes.
    wb1 = jnp.concatenate(
        [w1.astype(jnp.float32), b1.reshape(1, H).astype(jnp.float32)], axis=0
    )                                                         # [K+1, H]
    w2p = jnp.pad(w2.astype(jnp.float32), ((0, 0), (0, c_pad - C)))
    b2p = jnp.pad(b2.reshape(1, C).astype(jnp.float32),
                  ((0, 0), (0, c_pad - C)), constant_values=NEG_BIG)
    wb2 = jnp.concatenate([w2p, b2p], axis=0)                 # [H+1, C_PAD]

    # Batch tile: full batch if it is small, otherwise 1024-row tiles
    # (multiple of 8 sublanes; comfortably inside 32 MiB scoped VMEM with
    # double-buffering on v5e/v6e/v7x).
    tn = N if N <= tile_n else tile_n
    grid = (pl.cdiv(N, tn),)

    out = pl.pallas_call(
        net_qc_w_kernel,
        out_shape=jax.ShapeDtypeStruct((N, c_pad), jnp.float32),
        grid=grid,
        in_specs=[
            pl.BlockSpec((tn, K), lambda i: (i, 0)),           # x: tiled over batch
            pl.BlockSpec((K + 1, H), lambda i: (0, 0)),        # packed fc1 params
            pl.BlockSpec((H + 1, c_pad), lambda i: (0, 0)),    # packed fc3 params
        ],
        out_specs=pl.BlockSpec((tn, c_pad), lambda i: (i, 0)),  # lane-dense output
        compiler_params=pltpu.CompilerParams(
            dimension_semantics=("parallel",),       # megacore sharding on v7x
            vmem_limit_bytes=32 * 1024 * 1024,       # explicit, safe on all gens
        ),
        cost_estimate=pl.CostEstimate(
            flops=2 * N * K * H + 2 * N * H * c_pad,
            transcendentals=N * (H + c_pad),
            bytes_accessed=(x.size * x.dtype.itemsize
                            + N * c_pad * 4
                            + (wb1.size + wb2.size) * 4),
        ),
    )(x, wb1, wb2)

    return out[:, :C]


def init_params(key, K, C):
    """Deterministic init mimicking PyTorch Linear default (uniform ±1/sqrt(fan_in))."""
    k1, k2, k3, k4 = jax.random.split(key, 4)
    bound1 = 1.0 / jnp.sqrt(K)
    bound2 = 1.0 / jnp.sqrt(HIDDEN)
    w1 = jax.random.uniform(k1, (K, HIDDEN), jnp.float32, -bound1, bound1)
    b1 = jax.random.uniform(k2, (HIDDEN,), jnp.float32, -bound1, bound1)
    w2 = jax.random.uniform(k3, (HIDDEN, C), jnp.float32, -bound2, bound2)
    b2 = jax.random.uniform(k4, (C,), jnp.float32, -bound2, bound2)
    return w1, b1, w2, b2


if __name__ == "__main__":
    K, C, N = 8, 4, 8  # small shapes: batch=8, input dim K=8, classes C=4

    key = jax.random.PRNGKey(0)
    kx, kp = jax.random.split(key)
    x = jax.random.normal(kx, (N, K), jnp.float32)
    w1, b1, w2, b2 = init_params(kp, K, C)

    out = net_qc_w_forward(x, w1, b1, w2, b2)
    out = jax.block_until_ready(out)

    # sanity check vs. plain-JAX reference
    ref = jax.nn.softmax(jnp.tanh(x @ w1 + b1) @ w2 + b2, axis=-1)
    assert out.shape == (N, C)
    assert jnp.allclose(out, ref, atol=1e-5, rtol=1e-5)
    assert jnp.allclose(jnp.sum(out, axis=-1), 1.0, atol=1e-5)

    print("KERNEL_OK")
</pallas_src>

<mosaic_0001>
module attributes {stable_mosaic.version = 11 : i64} {
  func.func @net_qc_w_kernel(%arg0: i32, %arg1: memref<8x8xf32, #tpu.memory_space<vmem>>, %arg2: memref<9x32xf32, #tpu.memory_space<vmem>>, %arg3: memref<33x128xf32, #tpu.memory_space<vmem>>, %arg4: memref<8x128xf32, #tpu.memory_space<vmem>>) attributes {dimension_semantics = [#tpu.dimension_semantics<parallel>], iteration_bounds = array<i64: 1>, scalar_prefetch = 0 : i64, scratch_operands = 0 : i64, tpu.core_type = #tpu.core_type<tc>, window_params = [{transform_indices = @transform_0, window_bounds = array<i64: 8, 8>}, {pipeline_mode = #tpu.pipeline_mode<synchronous>, transform_indices = @transform_1, window_bounds = array<i64: 9, 32>}, {pipeline_mode = #tpu.pipeline_mode<synchronous>, transform_indices = @transform_2, window_bounds = array<i64: 33, 128>}, {transform_indices = @transform_3, window_bounds = array<i64: 8, 128>}]} {
    %c0 = arith.constant 0 : index
    %c0_0 = arith.constant 0 : index
    %0 = vector.load %arg1[%c0, %c0_0] : memref<8x8xf32, #tpu.memory_space<vmem>>, vector<8x8xf32>
    %c0_1 = arith.constant 0 : index
    %c0_2 = arith.constant 0 : index
    %1 = vector.load %arg2[%c0_1, %c0_2] : memref<9x32xf32, #tpu.memory_space<vmem>>, vector<8x32xf32>
    %c8 = arith.constant 8 : index
    %c0_3 = arith.constant 0 : index
    %2 = vector.load %arg2[%c8, %c0_3] : memref<9x32xf32, #tpu.memory_space<vmem>>, vector<1x32xf32>
    %c0_4 = arith.constant 0 : index
    %c0_5 = arith.constant 0 : index
    %3 = vector.load %arg3[%c0_4, %c0_5] : memref<33x128xf32, #tpu.memory_space<vmem>>, vector<32x128xf32>
    %c32 = arith.constant 32 : index
    %c0_6 = arith.constant 0 : index
    %4 = vector.load %arg3[%c32, %c0_6] : memref<33x128xf32, #tpu.memory_space<vmem>>, vector<1x128xf32>
    %cst = arith.constant dense<0.000000e+00> : vector<8x32xf32>
    %5 = tpu.matmul %0, %1, %cst {dimension_numbers = #tpu.dot_dimension_numbers<[1], [0], [0], [1], [0, 0, 1, 1], [], []>} : vector<8x8xf32>, vector<8x32xf32>, vector<8x32xf32> -> vector<8x32xf32>
    %6 = vector.broadcast %2 : vector<1x32xf32> to vector<8x32xf32>
    %7 = arith.addf %5, %6 : vector<8x32xf32>
    %8 = math.tanh %7 : vector<8x32xf32>
    %cst_7 = arith.constant dense<0.000000e+00> : vector<8x128xf32>
    %9 = tpu.matmul %8, %3, %cst_7 {dimension_numbers = #tpu.dot_dimension_numbers<[1], [0], [0], [1], [0, 0, 1, 1], [], []>} : vector<8x32xf32>, vector<32x128xf32>, vector<8x128xf32> -> vector<8x128xf32>
    %10 = vector.broadcast %4 : vector<1x128xf32> to vector<8x128xf32>
    %11 = arith.addf %9, %10 : vector<8x128xf32>
    %cst_8 = arith.constant dense<0xFF800000> : vector<8xf32>
    %12 = vector.multi_reduction <maximumf>, %11, %cst_8 [1] : vector<8x128xf32> to vector<8xf32>
    %13 = vector.shape_cast %12 : vector<8xf32> to vector<8x1xf32>
    %14 = vector.broadcast %13 : vector<8x1xf32> to vector<8x128xf32>
    %15 = arith.subf %11, %14 : vector<8x128xf32>
    %16 = math.exp %15 : vector<8x128xf32>
    %cst_9 = arith.constant dense<0.000000e+00> : vector<8xf32>
    %17 = vector.multi_reduction <add>, %16, %cst_9 [1] : vector<8x128xf32> to vector<8xf32>
    %18 = vector.shape_cast %17 : vector<8xf32> to vector<8x1xf32>
    %19 = vector.broadcast %18 : vector<8x1xf32> to vector<8x128xf32>
    %20 = arith.divf %16, %19 : vector<8x128xf32>
    %c0_10 = arith.constant 0 : index
    %c0_11 = arith.constant 0 : index
    %21 = vector.load %arg4[%c0_10, %c0_11] : memref<8x128xf32, #tpu.memory_space<vmem>>, vector<8x128xf32>
    tpu.vector_store %arg4[%c0_10, %c0_11], %20 {strides = array<i32>} : memref<8x128xf32, #tpu.memory_space<vmem>>, vector<8x128xf32>,
    return
  }
  func.func @transform_0(%arg0: i32) -> (i32, i32) {
    %c0_i32 = arith.constant 0 : i32
    %c0_i32_0 = arith.constant 0 : i32
    return %arg0, %c0_i32 : i32, i32
  }
  func.func @transform_1(%arg0: i32) -> (i32, i32) {
    %c0_i32 = arith.constant 0 : i32
    %c0_i32_0 = arith.constant 0 : i32
    %c0_i32_1 = arith.constant 0 : i32
    return %c0_i32, %c0_i32_0 : i32, i32
  }
  func.func @transform_2(%arg0: i32) -> (i32, i32) {
    %c0_i32 = arith.constant 0 : i32
    %c0_i32_0 = arith.constant 0 : i32
    %c0_i32_1 = arith.constant 0 : i32
    return %c0_i32, %c0_i32_0 : i32, i32
  }
  func.func @transform_3(%arg0: i32) -> (i32, i32) {
    %c0_i32 = arith.constant 0 : i32
    %c0_i32_0 = arith.constant 0 : i32
    return %arg0, %c0_i32 : i32, i32
  }
}

</mosaic_0001>

<bundles_post_ra>
// kernel: tpu_custom_call.1
= control target key start
LH: loop header
LB: loop body
LE: loop exit
PB: predicated region body
PF: predicated region fallthrough
CT: control target
= control target key end

     0   :  { %8 = vsyncpa [#allocation3], 0  ;;  %s470_s0 = inlined_call_operand.hbm [shape: f32[8,8], index: 0, kind: input, shape index: {}]   ;;  %s471_s1 = inlined_call_operand.hbm [shape: f32[9,32], index: 1, kind: input, shape index: {}]   ;;  %s472_s2 = inlined_call_operand.hbm [shape: f32[33,128], index: 2, kind: input, shape index: {}]   ;;  %s473_s3 = inlined_call_operand.hbm [shape: f32[8,128], index: 3, kind: output, shape index: {}]  }
   0x1   :  { %9 = vsyncpa [#allocation6], 0 }
   0x2   :  { %10 = vsyncpa [#allocation4], 0  ;;  %s387_s12 = smov [#allocation5]   ;;  %s293_s16 = scalar_lea.hbm %s471_s1, 256 }
   0x3   :  { %s26_s13 = sshll.u32 %s387_s12, 4  ;;  %p294_p0 = scmp.ne.s32.totalorder %s471_s1, %s293_s16  ;;  %s27_s13 = int_to_ptr.vmem [resolvable:$true] %s26_s13 }
   0x4   :  { %p297_p1 = scmp.lt.u32.totalorder %s293_s16, %s471_s1 }
   0x6   :  { %p299_p2 = pnand %p297_p1, %p294_p0 }
   0x8   :  { %302 = shalt.err (!%p299_p2)
}
   0x9   :  { %s303_s21 = scalar_lea.vmem %s27_s13, 256  ;;  %p308_p4 = scmp.lt.s32.totalorder %s27_s13, %s27_s13 }
   0xa   :  { %p304_p3 = scmp.ne.s32.totalorder %s27_s13, %s303_s21  ;;  %p309_p5 = scmp.lt.s32.totalorder %s303_s21, %s303_s21 }
   0xc   :  { %p310_p6 = por %p309_p5, %p308_p4 }
   0xe   :  { %p311_p7 = pnand %p310_p6, %p304_p3 }
  0x10   :  { %314 = shalt.err (!%p311_p7)
}
  0x11   :  { %s388_s22 = smov 128   ;;  %s389_s23 = smov 8  }
  0x12   :  { %32 = dma.hbm_to_vmem [thread:$0]  %s471_s1, 256, %s27_s13, [#allocation6], %s388_s22, %s388_s22, %s389_s23  }
  0x13   :  { %s390_s26 = smov [#allocation2]   ;;  %s391_s28 = smov [#allocation7]  }
  0x14   :  { %s17_s27 = sshll.u32 %s390_s26, 4  ;;  %s38_s29 = sshll.u32 %s391_s28, 4  ;;  %s18_s27 = int_to_ptr.vmem [resolvable:$true] %s17_s27  ;;  %s39_s29 = int_to_ptr.vmem [resolvable:$true] %s38_s29 }
  0x15   :  { %s315_s5 = scalar_lea.hbm %s470_s0, 128 }
  0x16   :  { %p316_p8 = scmp.ne.s32.totalorder %s470_s0, %s315_s5  ;;  %p319_p9 = scmp.lt.u32.totalorder %s315_s5, %s470_s0 }
  0x18   :  { %p321_p10 = pnand %p319_p9, %p316_p8 }
  0x1a   :  { %324 = shalt.err (!%p321_p10)
}
  0x1b   :  { %s325_s1 = scalar_lea.vmem %s18_s27, 128  ;;  %p330_p12 = scmp.lt.s32.totalorder %s18_s27, %s18_s27 }
  0x1c   :  { %p326_p11 = scmp.ne.s32.totalorder %s18_s27, %s325_s1  ;;  %p331_p13 = scmp.lt.s32.totalorder %s325_s1, %s325_s1 }
  0x1e   :  { %p332_p0 = por %p331_p13, %p330_p12 }
  0x20   :  { %p333_p1 = pnand %p332_p0, %p326_p11 }
  0x22   :  { %336 = shalt.err (!%p333_p1)
}
  0x23   :  { %20 = dma.hbm_to_vmem [thread:$0]  %s470_s0, 128, %s18_s27, [#allocation3]  }
  0x24   :  { %s337_s14 = scalar_lea.hbm %s472_s2, 640 }
  0x25   :  { %p338_p2 = scmp.ne.s32.totalorder %s472_s2, %s337_s14  ;;  %p341_p3 = scmp.lt.u32.totalorder %s337_s14, %s472_s2 }
  0x27   :  { %p343_p4 = pnand %p341_p3, %p338_p2 }
  0x29   :  { %346 = shalt.err (!%p343_p4)
}
  0x2a   :  { %s347_s19 = scalar_lea.vmem %s39_s29, 640  ;;  %p352_p6 = scmp.lt.s32.totalorder %s39_s29, %s39_s29 }
  0x2b   :  { %p348_p5 = scmp.ne.s32.totalorder %s39_s29, %s347_s19  ;;  %p353_p7 = scmp.lt.s32.totalorder %s347_s19, %s347_s19 }
  0x2d   :  { %p354_p8 = por %p353_p7, %p352_p6 }
  0x2f   :  { %p355_p9 = pnand %p354_p8, %p348_p5 }
  0x31   :  { %358 = shalt.err (!%p355_p9)
}
  0x32   :  { %44 = dma.hbm_to_vmem [thread:$0]  %s472_s2, 640, %s39_s29, [#allocation6], %s388_s22, %s388_s22, %s389_s23  }
  0x33   :  { %381 = dma.done.wait [#allocation3], 128  }
  0x34   :  { %382 = vsyncadd [#allocation3], 4294967168 }
  0x35   :  { %383 = dma.done.wait [#allocation6], 896  }
  0x36   :  { %384 = vsyncadd [#allocation6], 4294966400  ;;  %v392_v0 = vmov 0.0   ;;  %vm393_vm0 = vmmov 0   ;;  %vm66_vm1 = vcmask 64512   ;;  %v55_v1 = vld [vmem:[#allocation5] sm:$0xff] }
  0x37   :  { %256 = vmatprep.subr.mxu0 %v392_v0  ;;  %258 = vmatprep.mubr.msk.f32.mxu0 %vm393_vm0, %v392_v0  ;;  %v54_v2 = vld [vmem:[#allocation2] sm:$0xff]  ;;  %v57_v3 = vld [vmem:[#allocation7] sm:$0xff]  ;;  %v59_v5 = vld [vmem:[#allocation7 + $0x10] sm:$0xff]  ;;  %v394_v6 = vmov 0.0|0.0   ;;  %vm145_vm2 = vcmask 261120   ;;  %s395_s2 = smov [#allocation8]  }
  0x38   :  { %269 = vmatprep.mubr.msk.f32.mxu1 %vm393_vm0, %v392_v0  ;;  %257 = vmatpush3.msra.mxu0 %v55_v1  ;;  %v58_v4 = vld [vmem:[#allocation7 + $0x8] sm:$0xff]  ;;  %v60_v8 = vld [vmem:[#allocation7 + $0x18] sm:$0xff]  ;;  %v247_v15 = vld [vmem:[#allocation7 + $0x20] ss:$0 sm:$0xff]  ;;  %s235_s21 = sshll.u32 %s395_s2, 4  ;;  %s236_s21 = int_to_ptr.vmem [resolvable:$true] %s235_s21 }
  0x39   :  { %259 = vmatmul.mubr.msk.f32.vlgmr.msra.gmra.mrb[0].mxu0 %vm66_vm1, %v54_v2  ;;  %272 = vmatprep.subr.bf16.mxu1 %v394_v6  ;;  %v273_v7 = vpack.c.bf16 %v58_v4, %v57_v3  ;;  %v276_v9 = vpack.c.bf16 %v60_v8, %v59_v5  ;;  %v245_v10 = vld [vmem:[#allocation5 + $0x8] ss:$0 sm:$0xff]  ;;  %s359_s22 = scalar_lea.vmem %s236_s21, 128  ;;  %p364_p11 = scmp.lt.s32.totalorder %s236_s21, %s236_s21 }
  0x3a   :  { %p360_p10 = scmp.ne.s32.totalorder %s236_s21, %s359_s22  ;;  %p365_p12 = scmp.lt.s32.totalorder %s359_s22, %s359_s22 }
  0x3b   :  { %274 = vmatpush3.bf16.msra.mxu1 %v273_v7 }
  0x3c   :  { %275 = vmatprep.subr.bf16.mxu1 %v394_v6  ;;  %p366_p13 = por %p365_p12, %p364_p11 }
  0x3e   :  { %p367_p0 = pnand %p366_p13, %p360_p10 }
  0x3f   :  { %277 = vmatpush3.bf16.msra.mxu1 %v276_v9 }
 0x10c   :  { %v136_v11 = vpop.f32.mrb[0].mxu0 }
 0x10d   :  { %v137_v12 = vadd.f32 %v245_v10, %v136_v11  ;;  %v260_v13 = vpop.f32.mrb[1].mxu0 }
 0x10f   :  { %287 = vtanh.f32 %v137_v12 }
 0x119   :  { %v288_v14 = vpop.eup %287 }
 0x11a   :  { %270 = vmatmul.mubr.msk.f32.vlgmr.msra.gmra.mrb[0].mxu1 %vm145_vm2, %v288_v14 }
 0x1ed   :  { %v215_v16 = vpop.f32.mrb[0].mxu1 }
 0x1ee   :  { %v216_v17 = vadd.f32 %v247_v15, %v215_v16  ;;  %v271_v18 = vpop.f32.mrb[1].mxu1 }
 0x1f0   :  { %219 = vmax.xlane.f32.xlu0 %v216_v17 }
 0x27d   :  { %v220_v19 = vpop.xlane.xlu0 %219 }
 0x27e   :  { %v221_v20 = vsub.f32 %v216_v17, %v220_v19 }
 0x280   :  { %v222_v21 = vmul.f32 1.442695, %v221_v20 }
 0x282   :  { %289 = vpow2.f32 %v222_v21 }
 0x28c   :  { %v290_v22 = vpop.eup %289 }
 0x28d   :  { %224 = vadd.xlane.f32.xlu0 %v290_v22 }
 0x31a   :  { %v225_v23 = vpop.xlane.xlu0 %224 }
 0x31b   :  { %291 = vrcp.f32 %v225_v23 }
 0x325   :  { %v292_v24 = vpop.eup %291 }
 0x326   :  { %v227_v25 = vmul.f32 %v292_v24, %v290_v22 }
 0x328   :  { %228 = vst [vmem:[#allocation8] sm:$0xff] %v227_v25 }
 0x329   :  { %370 = shalt.err (!%p367_p0)
}
 0x32a   :  { %s371_s25 = scalar_lea.hbm %s473_s3, 128 }
 0x32b   :  { %p372_p1 = scmp.ne.s32.totalorder %s473_s3, %s371_s25  ;;  %p375_p2 = scmp.lt.u32.totalorder %s371_s25, %s473_s3 }
 0x32d   :  { %p377_p3 = pnand %p375_p2, %p372_p1 }
 0x32f   :  { %380 = shalt.err (!%p377_p3)
}
 0x330   :  { %238 = dma.vmem_to_hbm [thread:$0]  %s236_s21, 128, %s473_s3, [#allocation4]  }
 0x331   :  { %385 = dma.done.wait [#allocation4], 128  }
 0x332   :  { %386 = vsyncadd [#allocation4], 4294967168 }
 0x333   :  { %242 = vsyncpa [#allocation3], 1 }
 0x334   :  { %243 = vsyncpa [#allocation6], 1 }
 0x335   :  { %244 = vsyncpa [#allocation4], 1 }

</bundles_post_ra>
